<compile_context>
chip_gen: v7x
topology: tpu7x:2x2x1
jax: 0.10.0
libtpu: 0.0.40
codegen_flags: <defaults>
</compile_context>

<pallas_src>
import math
from functools import partial

import jax
import jax.numpy as jnp
from jax.experimental import pallas as pl
from jax.experimental.pallas import tpu as pltpu


_MAX_TM = 1024          # upper bound on rows per grid step


# ----------------------------------------------------------------------------- kernels
def _softmask_kernel_resident(x_ref, w_ref, b_ref, o_ref):
    # Weight resident in VMEM.  x_ref: (tm, Dp)  w_ref: (Dp, Dp)  b_ref: (1, Dp).
    x = x_ref[...]                                               # native dtype -> MXU
    z = jnp.dot(x, w_ref[...], preferred_element_type=jnp.float32)
    mask = jax.nn.sigmoid(z + b_ref[...].astype(jnp.float32))    # f32 (EUP)
    # Gate in the input dtype (bf16-native VPU on v6e/v7x; f32 inputs stay f32).
    o_ref[...] = (x * mask.astype(x.dtype)).astype(o_ref.dtype)


def _softmask_kernel_ntiled(tn, xr_ref, w_ref, b_ref, o_ref):
    # Column-tiled weight.  Grid = (num_j, num_i): columns are the OUTER axis.
    # xr_ref: (tm, Dp) full rows (matmul)   w_ref: (Dp, tn)   b_ref: (1, tn)
    # o_ref:  (tm, tn).  The gating tile is sliced lane-aligned out of xr_ref
    # instead of streaming x from HBM a second time.
    j = pl.program_id(0)
    z = jnp.dot(xr_ref[...], w_ref[...], preferred_element_type=jnp.float32)
    mask = jax.nn.sigmoid(z + b_ref[...].astype(jnp.float32))
    col0 = pl.multiple_of(j * tn, 128)                           # lane-aligned slice
    xc = xr_ref[:, pl.ds(col0, tn)]
    o_ref[...] = (xc * mask.astype(xc.dtype)).astype(o_ref.dtype)


# ----------------------------------------------------------------------------- helpers
def _round_up(a, b):
    return (a + b - 1) // b * b


def _bspec(shape, index_map, *, buffers=None):
    """BlockSpec with an optional explicit buffer count (buffers=1 => single-buffered
    residency for constant-index operands).  Falls back to the default double-buffered
    spec if this jax build does not accept the pipeline_mode kwarg."""
    if buffers is not None:
        try:
            return pl.BlockSpec(shape, index_map, pipeline_mode=pl.Buffered(buffers))
        except Exception:            # pragma: no cover -- older jax
            pass
    return pl.BlockSpec(shape, index_map)


def _default_vmem_limit():
    # Raise above the 16/32 MiB scoped default, budgeting against *per-TensorCore*
    # physical VMEM (v7x: 64 MiB/TC; each TC holds its own resident-weight copy
    # when the row axis is megacore-sharded).
    try:
        cap = int(pltpu.get_tpu_info().vmem_capacity_bytes)
        return max(32 * 1024 * 1024, min(cap - 16 * 1024 * 1024, 100 * 1024 * 1024))
    except Exception:
        return 64 * 1024 * 1024


def _choose_tiles(M, Dp, itemsize, tm_req, tn_req, vmem_limit):
    """Return (tm, tn).  tn == Dp means the weight stays fully resident in VMEM."""
    sub = max(8, 32 // max(1, itemsize))     # dtype sublane multiple: f32 8, bf16 16, i8 32
    budget = int(0.85 * vmem_limit)

    def per_row_bytes(tn):
        # Double-buffered x row tile + output tile + f32 intermediates (z, mask).
        return 2 * Dp * itemsize + 2 * tn * itemsize + 2 * tn * 4 + Dp * 4

    # ---- residency / column-tile decision ------------------------------------------
    if tn_req is not None:
        assert tn_req % 128 == 0 and Dp % tn_req == 0, "tn must be a 128-multiple dividing padded D"
        tn = tn_req
        w_bytes = (Dp * Dp if tn == Dp else 2 * Dp * tn) * itemsize
    else:
        w_resident = Dp * Dp * itemsize      # single copy (pl.Buffered(1))
        if w_resident + sub * per_row_bytes(Dp) <= budget:
            tn, w_bytes = Dp, w_resident
        else:
            tn = min(Dp, 1024)
            while tn > 128 and (Dp % tn != 0
                                or 2 * Dp * tn * itemsize + sub * per_row_bytes(tn) > budget):
                tn -= 128
            w_bytes = 2 * Dp * tn * itemsize  # column tiles stay double-buffered

    # ---- row tile: fill the remaining VMEM budget -----------------------------------
    if tm_req is not None:
        tm = tm_req
    else:
        tm = max(sub, (budget - w_bytes) // max(1, per_row_bytes(tn)))
        tm = min(tm, _MAX_TM)
    if tm >= M:
        return M, tn                          # one row block; block dim == full array dim
    gran = 256 if tm >= 256 else (128 if tm >= 128 else sub)
    tm = max(sub, (tm // gran) * gran)
    return tm, tn


# ----------------------------------------------------------------------------- wrapper
def soft_mask(x, weight, bias, *, tm=None, tn=None, vmem_limit_bytes=None,
              cast_weight_to_input_dtype=True):
    """SoftMask forward:  out = x * sigmoid(x @ weight.T + bias).

    x: (..., D);  weight: (D, D) in nn.Linear layout (out, in);  bias: (D,).
    cast_weight_to_input_dtype: stream the weight in x.dtype (halves weight HBM/VMEM
    for bf16 activations; set False to keep the original weight dtype/numerics).
    """
    *lead, D = x.shape
    M = math.prod(lead) if lead else 1
    out_dtype = x.dtype
    itemsize = jnp.dtype(x.dtype).itemsize

    if vmem_limit_bytes is None:
        vmem_limit_bytes = _default_vmem_limit()

    Dp = _round_up(D, 128)                    # lane-dense, (8,128)-aligned
    tm_eff, tn_eff = _choose_tiles(M, Dp, itemsize, tm, tn, vmem_limit_bytes)

    # Layout in the wrapper.  Only the contraction dim D is zero-padded: padded x
    # columns x padded w rows contribute 0 to the dot, so the math stays exact.
    # Rows are NOT padded -- the boundary row block is masked by Pallas.
    x2 = x.reshape(M, D)
    w_t = weight.T                            # (in, out) so the kernel computes x @ w_t
    if cast_weight_to_input_dtype:
        w_t = w_t.astype(x.dtype)             # native MXU dtype
    b2 = bias.astype(jnp.float32).reshape(1, D)
    if Dp != D:
        x2 = jnp.pad(x2, ((0, 0), (0, Dp - D)))
        w_t = jnp.pad(w_t, ((0, Dp - D), (0, Dp - D)))
        b2 = jnp.pad(b2, ((0, 0), (0, Dp - D)))

    num_i = pl.cdiv(M, tm_eff)
    num_j = Dp // tn_eff

    cost = pl.CostEstimate(
        flops=2 * M * Dp * Dp + M * Dp,
        transcendentals=M * Dp,
        bytes_accessed=(2 * M * Dp + Dp * Dp) * itemsize + Dp * 4,
    )

    if num_j == 1:
        # Fast path: weight + bias resident (single-buffered) in VMEM; grid only over
        # row tiles, megacore-sharded across TensorCores.
        out = pl.pallas_call(
            _softmask_kernel_resident,
            out_shape=jax.ShapeDtypeStruct((M, Dp), out_dtype),
            grid_spec=pltpu.PrefetchScalarGridSpec(
                num_scalar_prefetch=0,
                grid=(num_i,),
                in_specs=[
                    pl.BlockSpec((tm_eff, Dp), lambda i: (i, 0)),    # x rows (streamed)
                    _bspec((Dp, Dp), lambda i: (0, 0), buffers=1),   # weight (resident, 1 copy)
                    _bspec((1, Dp), lambda i: (0, 0), buffers=1),    # bias   (resident, 1 copy)
                ],
                out_specs=pl.BlockSpec((tm_eff, Dp), lambda i: (i, 0)),
            ),
            compiler_params=pltpu.CompilerParams(
                dimension_semantics=("parallel",),
                vmem_limit_bytes=vmem_limit_bytes,
            ),
            cost_estimate=cost,
        )(x2, w_t, b2)
    else:
        # Large-D path: tile the weight / output over columns.  Column axis is the
        # OUTER grid axis and the weight's index map depends only on it, so each
        # (Dp, tn) weight tile is fetched from HBM once per column block.  x full
        # rows are streamed once; the gating tile is sliced from them in-kernel.
        out = pl.pallas_call(
            partial(_softmask_kernel_ntiled, tn_eff),
            out_shape=jax.ShapeDtypeStruct((M, Dp), out_dtype),
            grid_spec=pltpu.PrefetchScalarGridSpec(
                num_scalar_prefetch=0,
                grid=(num_j, num_i),
                in_specs=[
                    pl.BlockSpec((tm_eff, Dp), lambda j, i: (i, 0)),   # x full rows
                    pl.BlockSpec((Dp, tn_eff), lambda j, i: (0, j)),   # weight column tile
                    pl.BlockSpec((1, tn_eff), lambda j, i: (0, j)),    # bias tile
                ],
                out_specs=pl.BlockSpec((tm_eff, tn_eff), lambda j, i: (i, j)),
            ),
            compiler_params=pltpu.CompilerParams(
                dimension_semantics=("parallel", "parallel"),
                vmem_limit_bytes=vmem_limit_bytes,
            ),
            cost_estimate=cost,
        )(x2, w_t, b2)

    if Dp != D:
        out = out[:, :D]
    return out.reshape(*lead, D)


# ----------------------------------------------------------------------------- self-test
if __name__ == "__main__":
    key = jax.random.PRNGKey(0)
    kx, kw, kb, kx2, kw2, kb2 = jax.random.split(key, 6)

    # --- Test 1: shapes implied by the module (B=2, S=8, D=32), f32, resident path.
    B, S, D = 2, 8, 32
    x = jax.random.normal(kx, (B, S, D), dtype=jnp.float32)
    bound = 1.0 / jnp.sqrt(jnp.float32(D))
    weight = jax.random.uniform(kw, (D, D), minval=-bound, maxval=bound, dtype=jnp.float32)
    bias = jax.random.uniform(kb, (D,), minval=-bound, maxval=bound, dtype=jnp.float32)

    out = jax.block_until_ready(soft_mask(x, weight, bias))
    ref = x * jax.nn.sigmoid(
        jnp.einsum("bsd,od->bso", x, weight, precision=jax.lax.Precision.HIGHEST) + bias)
    assert out.shape == (B, S, D)
    assert out.dtype == x.dtype
    assert jnp.allclose(out, ref, atol=1e-5, rtol=1e-5), float(jnp.max(jnp.abs(out - ref)))

    # --- Test 2: exercise D padding, unpadded-row boundary masking and the
    #             column-tiled (large-D) path with the (columns, rows) grid order.
    B2, S2, D2 = 2, 50, 200          # M=100 (not a tile multiple); D=200 -> padded 256
    x_b = jax.random.normal(kx2, (B2, S2, D2), dtype=jnp.float32)
    bound2 = 1.0 / jnp.sqrt(jnp.float32(D2))
    weight2 = jax.random.uniform(kw2, (D2, D2), minval=-bound2, maxval=bound2, dtype=jnp.float32)
    bias2 = jax.random.uniform(kb2, (D2,), minval=-bound2, maxval=bound2, dtype=jnp.float32)

    out2 = jax.block_until_ready(soft_mask(x_b, weight2, bias2, tm=64, tn=128))
    ref2 = x_b * jax.nn.sigmoid(
        jnp.einsum("bsd,od->bso", x_b, weight2, precision=jax.lax.Precision.HIGHEST) + bias2)
    assert out2.shape == (B2, S2, D2)
    assert jnp.allclose(out2, ref2, atol=1e-4, rtol=1e-4), float(jnp.max(jnp.abs(out2 - ref2)))

    print("KERNEL_OK")
</pallas_src>

<mosaic_0001>
module attributes {stable_mosaic.version = 11 : i64} {
  func.func @_softmask_kernel_resident(%arg0: i32, %arg1: memref<16x128xf32, #tpu.memory_space<vmem>>, %arg2: memref<128x128xf32, #tpu.memory_space<vmem>>, %arg3: memref<1x128xf32, #tpu.memory_space<vmem>>, %arg4: memref<16x128xf32, #tpu.memory_space<vmem>>) attributes {dimension_semantics = [#tpu.dimension_semantics<parallel>], iteration_bounds = array<i64: 1>, scalar_prefetch = 0 : i64, scratch_operands = 0 : i64, tpu.core_type = #tpu.core_type<tc>, window_params = [{transform_indices = @transform_0, window_bounds = array<i64: 16, 128>}, {pipeline_mode = #tpu.pipeline_mode<synchronous>, transform_indices = @transform_1, window_bounds = array<i64: 128, 128>}, {pipeline_mode = #tpu.pipeline_mode<synchronous>, transform_indices = @transform_2, window_bounds = array<i64: 1, 128>}, {transform_indices = @transform_3, window_bounds = array<i64: 16, 128>}]} {
    %c0 = arith.constant 0 : index
    %c0_0 = arith.constant 0 : index
    %0 = vector.load %arg1[%c0, %c0_0] : memref<16x128xf32, #tpu.memory_space<vmem>>, vector<16x128xf32>
    %c0_1 = arith.constant 0 : index
    %c0_2 = arith.constant 0 : index
    %1 = vector.load %arg2[%c0_1, %c0_2] : memref<128x128xf32, #tpu.memory_space<vmem>>, vector<128x128xf32>
    %cst = arith.constant dense<0.000000e+00> : vector<16x128xf32>
    %2 = tpu.matmul %0, %1, %cst {dimension_numbers = #tpu.dot_dimension_numbers<[1], [0], [0], [1], [0, 0, 1, 1], [], []>} : vector<16x128xf32>, vector<128x128xf32>, vector<16x128xf32> -> vector<16x128xf32>
    %c0_3 = arith.constant 0 : index
    %c0_4 = arith.constant 0 : index
    %3 = vector.load %arg3[%c0_3, %c0_4] : memref<1x128xf32, #tpu.memory_space<vmem>>, vector<1x128xf32>
    %4 = vector.broadcast %3 : vector<1x128xf32> to vector<16x128xf32>
    %5 = arith.addf %2, %4 : vector<16x128xf32>
    %6 = arith.negf %5 : vector<16x128xf32>
    %7 = math.exp %6 : vector<16x128xf32>
    %cst_5 = arith.constant 1.000000e+00 : f32
    %8 = vector.broadcast %cst_5 : f32 to vector<16x128xf32>
    %9 = arith.addf %8, %7 : vector<16x128xf32>
    %10 = arith.divf %8, %9 : vector<16x128xf32>
    %11 = arith.mulf %0, %10 : vector<16x128xf32>
    %c0_6 = arith.constant 0 : index
    %c0_7 = arith.constant 0 : index
    %12 = vector.load %arg4[%c0_6, %c0_7] : memref<16x128xf32, #tpu.memory_space<vmem>>, vector<16x128xf32>
    tpu.vector_store %arg4[%c0_6, %c0_7], %11 {strides = array<i32>} : memref<16x128xf32, #tpu.memory_space<vmem>>, vector<16x128xf32>,
    return
  }
  func.func @transform_0(%arg0: i32) -> (i32, i32) {
    %c0_i32 = arith.constant 0 : i32
    %c0_i32_0 = arith.constant 0 : i32
    return %arg0, %c0_i32 : i32, i32
  }
  func.func @transform_1(%arg0: i32) -> (i32, i32) {
    %c0_i32 = arith.constant 0 : i32
    %c0_i32_0 = arith.constant 0 : i32
    %c0_i32_1 = arith.constant 0 : i32
    return %c0_i32, %c0_i32_0 : i32, i32
  }
  func.func @transform_2(%arg0: i32) -> (i32, i32) {
    %c0_i32 = arith.constant 0 : i32
    %c0_i32_0 = arith.constant 0 : i32
    %c0_i32_1 = arith.constant 0 : i32
    return %c0_i32, %c0_i32_0 : i32, i32
  }
  func.func @transform_3(%arg0: i32) -> (i32, i32) {
    %c0_i32 = arith.constant 0 : i32
    %c0_i32_0 = arith.constant 0 : i32
    return %arg0, %c0_i32 : i32, i32
  }
}

</mosaic_0001>

<bundles_post_ra>
// kernel: tpu_custom_call.1
= control target key start
LH: loop header
LB: loop body
LE: loop exit
PB: predicated region body
PF: predicated region fallthrough
CT: control target
= control target key end

     0   :  { %8 = vsyncpa [#allocation3], 0  ;;  %s474_s0 = inlined_call_operand.hbm [shape: f32[16,128], index: 0, kind: input, shape index: {}]   ;;  %s475_s1 = inlined_call_operand.hbm [shape: f32[128,128], index: 1, kind: input, shape index: {}]   ;;  %s476_s2 = inlined_call_operand.hbm [shape: f32[1,128], index: 2, kind: input, shape index: {}]   ;;  %s477_s3 = inlined_call_operand.hbm [shape: f32[16,128], index: 3, kind: output, shape index: {}]  }
   0x1   :  { %9 = vsyncpa [#allocation6], 0 }
   0x2   :  { %10 = vsyncpa [#allocation4], 0  ;;  %s384_s12 = smov [#allocation5]   ;;  %s385_s14 = smov [#allocation2]  }
   0x3   :  { %s28_s13 = sshll.u32 %s384_s12, 4  ;;  %s16_s15 = sshll.u32 %s385_s14, 4  ;;  %s29_s13 = int_to_ptr.vmem [resolvable:$true] %s28_s13  ;;  %s410_s15 = int_to_ptr.vmem [resolvable:$true] %s16_s15 }
   0x4   :  { %s290_s18 = scalar_lea.hbm %s475_s1, 2048 }
   0x5   :  { %p291_p0 = scmp.ne.s32.totalorder %s475_s1, %s290_s18  ;;  %p294_p1 = scmp.lt.u32.totalorder %s290_s18, %s475_s1 }
   0x7   :  { %p296_p2 = pnand %p294_p1, %p291_p0 }
   0x9   :  { %299 = shalt.err (!%p296_p2)
}
   0xa   :  { %s300_s23 = scalar_lea.vmem %s29_s13, 2048  ;;  %p305_p4 = scmp.lt.s32.totalorder %s29_s13, %s29_s13 }
   0xb   :  { %p301_p3 = scmp.ne.s32.totalorder %s29_s13, %s300_s23  ;;  %p306_p5 = scmp.lt.s32.totalorder %s300_s23, %s300_s23 }
   0xd   :  { %p307_p6 = por %p306_p5, %p305_p4 }
   0xf   :  { %p308_p7 = pnand %p307_p6, %p301_p3 }
  0x11   :  { %311 = shalt.err (!%p308_p7)
}
  0x12   :  { %s386_s24 = smov 128   ;;  %s387_s25 = smov 8  }
  0x13   :  { %34 = dma.hbm_to_vmem [thread:$0]  %s475_s1, 2048, %s29_s13, [#allocation6], %s386_s24, %s386_s24, %s387_s25  }
  0x14   :  { %s312_s30 = scalar_lea.hbm %s474_s0, 256 }
  0x15   :  { %p313_p8 = scmp.ne.s32.totalorder %s474_s0, %s312_s30  ;;  %p316_p9 = scmp.lt.u32.totalorder %s312_s30, %s474_s0 }
  0x17   :  { %p318_p10 = pnand %p316_p9, %p313_p8 }
  0x19   :  { %321 = shalt.err (!%p318_p10)
}
  0x1a   :  { %s322_s8 = scalar_lea.vmem %s410_s15, 256  ;;  %p327_p12 = scmp.lt.s32.totalorder %s410_s15, %s410_s15 }
  0x1b   :  { %p323_p11 = scmp.ne.s32.totalorder %s410_s15, %s322_s8  ;;  %p328_p13 = scmp.lt.s32.totalorder %s322_s8, %s322_s8 }
  0x1d   :  { %p329_p0 = por %p328_p13, %p327_p12 }
  0x1f   :  { %p330_p1 = pnand %p329_p0, %p323_p11 }
  0x21   :  { %333 = shalt.err (!%p330_p1)
}
  0x22   :  { %22 = dma.hbm_to_vmem [thread:$0]  %s474_s0, 256, %s410_s15, [#allocation3], %s386_s24, %s386_s24, %s387_s25  }
  0x23   :  { %s388_s10 = smov [#allocation7]   ;;  %s334_s14 = scalar_lea.hbm %s476_s2, 16 }
  0x24   :  { %s41_s11 = sshll.u32 %s388_s10, 4  ;;  %p335_p2 = scmp.ne.s32.totalorder %s476_s2, %s334_s14  ;;  %s42_s11 = int_to_ptr.vmem [resolvable:$true] %s41_s11 }
  0x25   :  { %p338_p3 = scmp.lt.u32.totalorder %s334_s14, %s476_s2 }
  0x27   :  { %p340_p4 = pnand %p338_p3, %p335_p2 }
  0x29   :  { %343 = shalt.err (!%p340_p4)
}
  0x2a   :  { %s344_s20 = scalar_lea.vmem %s42_s11, 16  ;;  %s348_s0 = scalar_lea.vmem %s42_s11, 32 }
  0x2b   :  { %p345_p5 = scmp.ne.s32.totalorder %s42_s11, %s344_s20  ;;  %p349_p6 = scmp.lt.s32.totalorder %s42_s11, %s42_s11 }
  0x2c   :  { %p350_p7 = scmp.lt.s32.totalorder %s348_s0, %s344_s20 }
  0x2e   :  { %p351_p8 = por %p350_p7, %p349_p6 }
  0x30   :  { %p352_p9 = pnand %p351_p8, %p345_p5 }
  0x32   :  { %355 = shalt.err (!%p352_p9)
}
  0x33   :  { %44 = dma.hbm_to_vmem [thread:$0]  %s476_s2, 16, %s42_s11, [#allocation6]  }
  0x34   :  { %378 = dma.done.wait [#allocation3], 256  }
  0x35   :  { %379 = vsyncadd [#allocation3], 4294967040 }
  0x36   :  { %380 = dma.done.wait [#allocation6], 2064  }
  0x37   :  { %381 = vsyncadd [#allocation6], 4294965232  ;;  %v56_v0 = vld [vmem:[#allocation5] sm:$0xff]  ;;  %v57_v1 = vld [vmem:[#allocation5 + $0x8] sm:$0xff]  ;;  %s389_s2 = smov [#allocation8]  }
  0x38   :  { %v58_v2 = vld [vmem:[#allocation5 + $0x10] sm:$0xff]  ;;  %v244_v3 = vpack.c.bf16 %v57_v1, %v56_v0  ;;  %v59_v4 = vld [vmem:[#allocation5 + $0x18] sm:$0xff]  ;;  %v60_v6 = vld [vmem:[#allocation5 + $0x20] sm:$0xff]  ;;  %s175_s22 = sshll.u32 %s389_s2, 4  ;;  %s176_s22 = int_to_ptr.vmem [resolvable:$true] %s175_s22 }
  0x39   :  { %v248_v5 = vpack.c.bf16 %v59_v4, %v58_v2  ;;  %v61_v7 = vld [vmem:[#allocation5 + $0x28] sm:$0xff]  ;;  %v54_v9 = vld [vmem:[#allocation2] sm:$0xff]  ;;  %v63_v11 = vld [vmem:[#allocation5 + $0x38] sm:$0xff]  ;;  %s356_s23 = scalar_lea.vmem %s176_s22, 256  ;;  %p361_p11 = scmp.lt.s32.totalorder %s176_s22, %s176_s22 }
  0x3a   :  { %245 = vmatprep.subr.bf16.mxu0 %v244_v3  ;;  %v252_v8 = vpack.c.bf16 %v61_v7, %v60_v6  ;;  %v62_v10 = vld [vmem:[#allocation5 + $0x30] sm:$0xff]  ;;  %241 = vmatprep.mubr.f32.mxu0 %v54_v9  ;;  %v64_v13 = vld [vmem:[#allocation5 + $0x40] sm:$0xff]  ;;  %v65_v14 = vld [vmem:[#allocation5 + $0x48] sm:$0xff]  ;;  %p357_p10 = scmp.ne.s32.totalorder %s176_s22, %s356_s23  ;;  %p362_p12 = scmp.lt.s32.totalorder %s356_s23, %s356_s23 }
  0x3b   :  { %247 = vmatpush3.bf16.msra.mxu0 %v244_v3  ;;  %v256_v12 = vpack.c.bf16 %v63_v11, %v62_v10  ;;  %v260_v15 = vpack.c.bf16 %v65_v14, %v64_v13  ;;  %v66_v16 = vld [vmem:[#allocation5 + $0x50] sm:$0xff]  ;;  %v67_v17 = vld [vmem:[#allocation5 + $0x58] sm:$0xff]  ;;  %v68_v19 = vld [vmem:[#allocation5 + $0x60] sm:$0xff] }
  0x3c   :  { %249 = vmatprep.subr.bf16.mxu0 %v248_v5  ;;  %v264_v18 = vpack.c.bf16 %v67_v17, %v66_v16  ;;  %v69_v20 = vld [vmem:[#allocation5 + $0x68] sm:$0xff]  ;;  %v70_v22 = vld [vmem:[#allocation5 + $0x70] sm:$0xff]  ;;  %v71_v23 = vld [vmem:[#allocation5 + $0x78] sm:$0xff]  ;;  %p363_p13 = por %p362_p12, %p361_p11 }
  0x3d   :  { %v268_v21 = vpack.c.bf16 %v69_v20, %v68_v19  ;;  %v272_v24 = vpack.c.bf16 %v71_v23, %v70_v22  ;;  %v55_v25 = vld [vmem:[#allocation2 + $0x8] sm:$0xff]  ;;  %v188_v26 = vld [vmem:[#allocation7] ss:$0 sm:$0xff] }
  0x3e   :  { %p364_p0 = pnand %p363_p13, %p357_p10 }
  0x3f   :  { %251 = vmatpush3.bf16.msra.mxu0 %v248_v5 }
  0x40   :  { %253 = vmatprep.subr.bf16.mxu0 %v252_v8 }
  0x43   :  { %255 = vmatpush3.bf16.msra.mxu0 %v252_v8 }
  0x44   :  { %257 = vmatprep.subr.bf16.mxu0 %v256_v12 }
  0x47   :  { %259 = vmatpush3.bf16.msra.mxu0 %v256_v12 }
  0x48   :  { %261 = vmatprep.subr.bf16.mxu0 %v260_v15 }
  0x4b   :  { %263 = vmatpush3.bf16.msra.mxu0 %v260_v15 }
  0x4c   :  { %265 = vmatprep.subr.bf16.mxu0 %v264_v18 }
  0x4f   :  { %267 = vmatpush3.bf16.msra.mxu0 %v264_v18 }
  0x50   :  { %269 = vmatprep.subr.bf16.mxu0 %v268_v21 }
  0x53   :  { %271 = vmatpush3.bf16.msra.mxu0 %v268_v21 }
  0x54   :  { %273 = vmatprep.subr.bf16.mxu0 %v272_v24 }
  0x57   :  { %275 = vmatpush3.bf16.msra.mxu0 %v272_v24 }
  0x5a   :  { %242 = vmatmul.mubr.f32.vlgmr.msra.gmra.mrb[0].mxu0 %v55_v25 }
 0x12d   :  { %v243_v27 = vpop.f32.mrb[0].mxu0 }
 0x12e   :  { %v151_v28 = vadd.f32 %v243_v27, %v188_v26  ;;  %v145_v29 = vpop.f32.mrb[1].mxu0 }
 0x12f   :  { %v146_v30 = vadd.f32 %v188_v26, %v145_v29 }
 0x130   :  { %v190_v31 = vmul.f32 -1.442695, %v151_v28 }
 0x131   :  { %v189_v32 = vmul.f32 -1.442695, %v146_v30 }
 0x132   :  { %282 = vpow2.f32 %v190_v31 }
 0x133   :  { %284 = vpow2.f32 %v189_v32 }
 0x13c   :  { %v283_v33 = vpop.eup %282 }
 0x13d   :  { %v285_v34 = vpop.eup %284  ;;  %v161_v35 = vadd.f32 1.0, %v283_v33 }
 0x13e   :  { %v160_v36 = vadd.f32 1.0, %v285_v34 }
 0x13f   :  { %286 = vrcp.f32 %v161_v35 }
 0x140   :  { %288 = vrcp.f32 %v160_v36 }
 0x149   :  { %v287_v37 = vpop.eup %286 }
 0x14a   :  { %v289_v38 = vpop.eup %288  ;;  %v167_v39 = vmul.f32 %v287_v37, %v55_v25 }
 0x14b   :  { %v166_v40 = vmul.f32 %v289_v38, %v54_v9 }
 0x14c   :  { %169 = vst [vmem:[#allocation8 + $0x8] sm:$0xff] %v167_v39 }
 0x14d   :  { %168 = vst [vmem:[#allocation8] sm:$0xff] %v166_v40 }
 0x14e   :  { %367 = shalt.err (!%p364_p0)
}
 0x14f   :  { %s368_s28 = scalar_lea.hbm %s477_s3, 256 }
 0x150   :  { %p369_p1 = scmp.ne.s32.totalorder %s477_s3, %s368_s28  ;;  %p372_p2 = scmp.lt.u32.totalorder %s368_s28, %s477_s3 }
 0x152   :  { %p374_p3 = pnand %p372_p2, %p369_p1 }
 0x154   :  { %377 = shalt.err (!%p374_p3)
}
 0x155   :  { %181 = dma.vmem_to_hbm [thread:$0]  %s176_s22, 256, %s477_s3, [#allocation4], %s386_s24, %s386_s24, %s387_s25  }
 0x156   :  { %382 = dma.done.wait [#allocation4], 256  }
 0x157   :  { %383 = vsyncadd [#allocation4], 4294967040 }
 0x158   :  { %185 = vsyncpa [#allocation3], 1 }
 0x159   :  { %186 = vsyncpa [#allocation6], 1 }
 0x15a   :  { %187 = vsyncpa [#allocation4], 1 }

</bundles_post_ra>
